<compile_context>
chip_gen: v5e
topology: v5e:2x2
jax: 0.10.0
libtpu: 0.0.40
codegen_flags: <defaults>
</compile_context>

<pallas_src>
import functools

import jax
import jax.numpy as jnp
from jax.experimental import pallas as pl
from jax.experimental.pallas import tpu as pltpu

EPS = 1e-6


def _round_up(x, m):
    return ((x + m - 1) // m) * m


def _pick_tn(d, requested=None):
    """Column (weight-N / output) tile. Full D stays resident for small D; large D is
    streamed in lane-aligned tiles so the weight never costs 2*D*D bytes of VMEM."""
    if requested is not None:
        return requested
    if d <= 1024:
        return d
    for cand in (1024, 512, 256, 128):  # 256-multiples fill the 256-wide MXU on v6e/v7x
        if d % cand == 0:
            return cand
    return d  # TODO(synk): D > 1024 not a multiple of 128 falls back to a resident weight.


def _sublayer_connection_kernel(x_ref, gamma_ref, beta_ref, w_ref, bsub_ref, o_ref, *, tn):
    # x_ref: (TM, D) row tile; w_ref: (D, TN) weight column tile; o_ref: (TM, TN).
    x = x_ref[...].astype(jnp.float32)
    d = x.shape[-1]

    # ---- LayerNorm (torch semantics: unbiased std, eps added to std) ----
    mean = jnp.mean(x, axis=-1, keepdims=True)
    diff = x - mean
    var_unbiased = jnp.sum(diff * diff, axis=-1, keepdims=True) * (1.0 / (d - 1))
    # Exact reciprocal: it acts on a (TM, 1) per-row vector, so it is negligible in every
    # regime and keeps approximation error out of the matmul (review feedback).
    inv = 1.0 / (jnp.sqrt(var_unbiased) + EPS)
    normed = gamma_ref[...] * (diff * inv) + beta_ref[...]

    # ---- sublayer: Linear(D, D), N-tiled on the MXU (bf16 operands, f32 accumulation) ----
    sub = jnp.dot(normed.astype(w_ref.dtype), w_ref[...],
                  preferred_element_type=jnp.float32) + bsub_ref[...]

    # ---- dropout (eval mode: identity) + residual add for this column tile ----
    if tn == d:  # single column tile: residual is the whole row (static branch)
        x_res = x
    else:        # slice the residual columns belonging to this N tile
        col0 = pl.multiple_of(pl.program_id(1) * tn, tn)
        x_res = x_ref[:, pl.ds(col0, tn)].astype(jnp.float32)
    o_ref[...] = (x_res + sub).astype(o_ref.dtype)


@functools.partial(jax.jit, static_argnames=("tm", "tn", "matmul_dtype", "out_dtype"))
def sublayer_connection(x, gamma, beta, w, b_sub, *, tm=512, tn=None,
                        matmul_dtype=jnp.bfloat16, out_dtype=None):
    """x: [B, S, D]; gamma/beta/b_sub: [D]; w: [D, D]. Returns [B, S, D] (eval-mode dropout)."""
    B, S, D = x.shape
    M = B * S
    out_dtype = x.dtype if out_dtype is None else jnp.dtype(out_dtype)
    x2 = x.reshape(M, D)

    # Row tile: multiple of 8 (f32 sublane), <= tm, never larger than M when M >= 8.
    # No padding / slicing of the activations: the row grid uses cdiv and Pallas masks the
    # out-of-bounds tail rows (independent rows; OOB writes are discarded), so there are
    # no extra HBM round-trips.  tm <= 512 also guarantees >= 2 parallel row steps once
    # M >= 1024 (v7x megacore sharding).
    if M >= 8:
        tm_eff = max(8, min(_round_up(tm, 8), (M // 8) * 8))
    else:
        tm_eff = 8
    tn_eff = _pick_tn(D, tn)

    grid = (pl.cdiv(M, tm_eff), pl.cdiv(D, tn_eff))
    ni, nj = grid

    gamma2 = gamma.reshape(1, D).astype(jnp.float32)
    beta2 = beta.reshape(1, D).astype(jnp.float32)
    bsub2 = b_sub.reshape(1, D).astype(jnp.float32)
    w_mm = w.astype(matmul_dtype)  # bf16 weight: MXU-rate operands + half the weight bytes

    xb = jnp.dtype(x.dtype).itemsize
    wb = jnp.dtype(matmul_dtype).itemsize
    ob = jnp.dtype(out_dtype).itemsize

    # Double-buffered VMEM footprint (x tile, weight tile, out tile, params) + margin for
    # in-kernel temporaries.  Clamp to 64 MiB: valid on v7x (64 MiB physical) while
    # lifting v5e's 16 MiB / v6e's 32 MiB scoped defaults.
    footprint = 2 * (tm_eff * D * xb + D * tn_eff * wb + tm_eff * tn_eff * ob + 4 * D * 4)
    vmem_limit = int(min(max(2 * footprint, 32 * 1024 * 1024), 64 * 1024 * 1024))

    cost = pl.CostEstimate(
        flops=2 * M * D * D + 10 * M * D * nj,
        transcendentals=M * nj,                                  # sqrt per row per column tile
        bytes_accessed=(M * D * xb                               # x in (one DMA per row tile)
                        + (ni if nj > 1 else 1) * D * D * wb     # weight (re-streamed per row tile iff N-tiled)
                        + 3 * D * 4                              # gamma / beta / bias
                        + M * D * ob),                           # out
    )

    out2 = pl.pallas_call(
        functools.partial(_sublayer_connection_kernel, tn=tn_eff),
        out_shape=jax.ShapeDtypeStruct((M, D), out_dtype),
        grid=grid,
        in_specs=[
            pl.BlockSpec((tm_eff, D), lambda i, j: (i, 0)),    # x rows (constant over j -> fetched once per i)
            pl.BlockSpec((1, D), lambda i, j: (0, 0)),         # gamma (broadcast)
            pl.BlockSpec((1, D), lambda i, j: (0, 0)),         # beta  (broadcast)
            pl.BlockSpec((D, tn_eff), lambda i, j: (0, j)),    # weight column tile
            pl.BlockSpec((1, tn_eff), lambda i, j: (0, j)),    # sublayer bias column tile
        ],
        out_specs=pl.BlockSpec((tm_eff, tn_eff), lambda i, j: (i, j)),
        compiler_params=pltpu.CompilerParams(
            dimension_semantics=("parallel", "parallel"),
            vmem_limit_bytes=vmem_limit,
        ),
        cost_estimate=cost,
    )(x2, gamma2, beta2, w_mm, bsub2)

    return out2.reshape(B, S, D)


def _reference(x, gamma, beta, w, b_sub):
    # Pure-JAX reference mirroring the PyTorch forward (eval mode, full f32).
    mean = jnp.mean(x, axis=-1, keepdims=True)
    std = jnp.std(x, axis=-1, keepdims=True, ddof=1)
    normed = gamma * (x - mean) / (std + EPS) + beta
    sub = normed @ w + b_sub
    return x + sub


def _make_inputs(key, B, S, D):
    kx, kw, kb = jax.random.split(key, 3)
    x = jax.random.normal(kx, (B, S, D), dtype=jnp.float32)
    # LayerNorm params initialized exactly as in the module (__init__): ones / zeros.
    gamma = jnp.ones((D,), dtype=jnp.float32)
    beta = jnp.zeros((D,), dtype=jnp.float32)
    # Deterministic synthetic sublayer = Linear(D, D).
    w = jax.random.normal(kw, (D, D), dtype=jnp.float32) / jnp.sqrt(D)
    b_sub = jax.random.normal(kb, (D,), dtype=jnp.float32) * 0.01
    return x, gamma, beta, w, b_sub


if __name__ == "__main__":
    key = jax.random.PRNGKey(0)
    k1, k2 = jax.random.split(key)

    # ---- primary small case (module-consistent shapes): batch=2, seq=8, hidden=128 ----
    x, gamma, beta, w, b_sub = _make_inputs(k1, 2, 8, 128)
    out = jax.block_until_ready(sublayer_connection(x, gamma, beta, w, b_sub))
    ref = _reference(x, gamma, beta, w, b_sub)
    assert out.shape == x.shape
    # Tolerance covers bf16 MXU operand rounding (f32 accumulation); f32 matmul path
    # available via matmul_dtype=jnp.float32.
    assert jnp.allclose(out, ref, atol=2e-2, rtol=2e-2), "mismatch vs reference (case 1)"

    # ---- exercise multi row tiles + N-tiled weight + masked tail (M=100, tm=64, tn=128) ----
    x2_, g2_, b2_, w2_, bs2_ = _make_inputs(k2, 2, 50, 256)
    out2 = jax.block_until_ready(
        sublayer_connection(x2_, g2_, b2_, w2_, bs2_, tm=64, tn=128))
    ref2 = _reference(x2_, g2_, b2_, w2_, bs2_)
    assert out2.shape == x2_.shape
    assert jnp.allclose(out2, ref2, atol=2e-2, rtol=2e-2), "mismatch vs reference (case 2)"

    print("KERNEL_OK")
</pallas_src>

<mosaic_0001>
module attributes {stable_mosaic.version = 11 : i64} {
  func.func @_sublayer_connection_kernel(%arg0: i32, %arg1: i32, %arg2: memref<16x128xf32, #tpu.memory_space<vmem>>, %arg3: memref<1x128xf32, #tpu.memory_space<vmem>>, %arg4: memref<1x128xf32, #tpu.memory_space<vmem>>, %arg5: memref<128x128xbf16, #tpu.memory_space<vmem>>, %arg6: memref<1x128xf32, #tpu.memory_space<vmem>>, %arg7: memref<16x128xf32, #tpu.memory_space<vmem>>) attributes {dimension_semantics = [#tpu.dimension_semantics<parallel>, #tpu.dimension_semantics<parallel>], iteration_bounds = array<i64: 1, 1>, scalar_prefetch = 0 : i64, scratch_operands = 0 : i64, tpu.core_type = #tpu.core_type<tc>, window_params = [{transform_indices = @transform_0, window_bounds = array<i64: 16, 128>}, {pipeline_mode = #tpu.pipeline_mode<synchronous>, transform_indices = @transform_1, window_bounds = array<i64: 1, 128>}, {pipeline_mode = #tpu.pipeline_mode<synchronous>, transform_indices = @transform_2, window_bounds = array<i64: 1, 128>}, {transform_indices = @transform_3, window_bounds = array<i64: 128, 128>}, {transform_indices = @transform_4, window_bounds = array<i64: 1, 128>}, {transform_indices = @transform_5, window_bounds = array<i64: 16, 128>}]} {
    %c0 = arith.constant 0 : index
    %c0_0 = arith.constant 0 : index
    %0 = vector.load %arg2[%c0, %c0_0] : memref<16x128xf32, #tpu.memory_space<vmem>>, vector<16x128xf32>
    %cst = arith.constant dense<0.000000e+00> : vector<16xf32>
    %1 = vector.multi_reduction <add>, %0, %cst [1] : vector<16x128xf32> to vector<16xf32>
    %2 = vector.shape_cast %1 : vector<16xf32> to vector<16x1xf32>
    %cst_1 = arith.constant 1.280000e+02 : f32
    %3 = vector.broadcast %cst_1 : f32 to vector<16x1xf32>
    %4 = arith.divf %2, %3 : vector<16x1xf32>
    %5 = vector.broadcast %4 : vector<16x1xf32> to vector<16x128xf32>
    %6 = arith.subf %0, %5 : vector<16x128xf32>
    %7 = arith.mulf %6, %6 : vector<16x128xf32>
    %cst_2 = arith.constant dense<0.000000e+00> : vector<16xf32>
    %8 = vector.multi_reduction <add>, %7, %cst_2 [1] : vector<16x128xf32> to vector<16xf32>
    %9 = vector.shape_cast %8 : vector<16xf32> to vector<16x1xf32>
    %cst_3 = arith.constant 0.00787401571 : f32
    %10 = vector.broadcast %cst_3 : f32 to vector<16x1xf32>
    %11 = arith.mulf %9, %10 : vector<16x1xf32>
    %12 = math.sqrt %11 : vector<16x1xf32>
    %cst_4 = arith.constant 9.99999997E-7 : f32
    %13 = vector.broadcast %cst_4 : f32 to vector<16x1xf32>
    %14 = arith.addf %12, %13 : vector<16x1xf32>
    %cst_5 = arith.constant 1.000000e+00 : f32
    %15 = vector.broadcast %cst_5 : f32 to vector<16x1xf32>
    %16 = arith.divf %15, %14 : vector<16x1xf32>
    %c0_6 = arith.constant 0 : index
    %c0_7 = arith.constant 0 : index
    %17 = vector.load %arg3[%c0_6, %c0_7] : memref<1x128xf32, #tpu.memory_space<vmem>>, vector<1x128xf32>
    %18 = vector.broadcast %16 : vector<16x1xf32> to vector<16x128xf32>
    %19 = arith.mulf %6, %18 : vector<16x128xf32>
    %20 = vector.broadcast %17 : vector<1x128xf32> to vector<16x128xf32>
    %21 = arith.mulf %20, %19 : vector<16x128xf32>
    %c0_8 = arith.constant 0 : index
    %c0_9 = arith.constant 0 : index
    %22 = vector.load %arg4[%c0_8, %c0_9] : memref<1x128xf32, #tpu.memory_space<vmem>>, vector<1x128xf32>
    %23 = vector.broadcast %22 : vector<1x128xf32> to vector<16x128xf32>
    %24 = arith.addf %21, %23 : vector<16x128xf32>
    %25 = arith.truncf %24 : vector<16x128xf32> to vector<16x128xbf16>
    %c0_10 = arith.constant 0 : index
    %c0_11 = arith.constant 0 : index
    %26 = vector.load %arg5[%c0_10, %c0_11] : memref<128x128xbf16, #tpu.memory_space<vmem>>, vector<128x128xbf16>
    %cst_12 = arith.constant dense<0.000000e+00> : vector<16x128xf32>
    %27 = tpu.matmul %25, %26, %cst_12 {dimension_numbers = #tpu.dot_dimension_numbers<[1], [0], [0], [1], [0, 0, 1, 1], [], []>} : vector<16x128xbf16>, vector<128x128xbf16>, vector<16x128xf32> -> vector<16x128xf32>
    %c0_13 = arith.constant 0 : index
    %c0_14 = arith.constant 0 : index
    %28 = vector.load %arg6[%c0_13, %c0_14] : memref<1x128xf32, #tpu.memory_space<vmem>>, vector<1x128xf32>
    %29 = vector.broadcast %28 : vector<1x128xf32> to vector<16x128xf32>
    %30 = arith.addf %27, %29 : vector<16x128xf32>
    %31 = arith.addf %0, %30 : vector<16x128xf32>
    %c0_15 = arith.constant 0 : index
    %c0_16 = arith.constant 0 : index
    %32 = vector.load %arg7[%c0_15, %c0_16] : memref<16x128xf32, #tpu.memory_space<vmem>>, vector<16x128xf32>
    tpu.vector_store %arg7[%c0_15, %c0_16], %31 {strides = array<i32>} : memref<16x128xf32, #tpu.memory_space<vmem>>, vector<16x128xf32>,
    return
  }
  func.func @transform_0(%arg0: i32, %arg1: i32) -> (i32, i32) {
    %c0_i32 = arith.constant 0 : i32
    %c0_i32_0 = arith.constant 0 : i32
    return %arg0, %c0_i32 : i32, i32
  }
  func.func @transform_1(%arg0: i32, %arg1: i32) -> (i32, i32) {
    %c0_i32 = arith.constant 0 : i32
    %c0_i32_0 = arith.constant 0 : i32
    %c0_i32_1 = arith.constant 0 : i32
    return %c0_i32, %c0_i32_0 : i32, i32
  }
  func.func @transform_2(%arg0: i32, %arg1: i32) -> (i32, i32) {
    %c0_i32 = arith.constant 0 : i32
    %c0_i32_0 = arith.constant 0 : i32
    %c0_i32_1 = arith.constant 0 : i32
    return %c0_i32, %c0_i32_0 : i32, i32
  }
  func.func @transform_3(%arg0: i32, %arg1: i32) -> (i32, i32) {
    %c0_i32 = arith.constant 0 : i32
    %c0_i32_0 = arith.constant 0 : i32
    return %c0_i32, %arg1 : i32, i32
  }
  func.func @transform_4(%arg0: i32, %arg1: i32) -> (i32, i32) {
    %c0_i32 = arith.constant 0 : i32
    %c0_i32_0 = arith.constant 0 : i32
    return %c0_i32, %arg1 : i32, i32
  }
  func.func @transform_5(%arg0: i32, %arg1: i32) -> (i32, i32) {
    %c0_i32 = arith.constant 0 : i32
    return %arg0, %arg1 : i32, i32
  }
}

</mosaic_0001>

<bundles_post_ra>
// kernel: sublayer_connection.1
= control target key start
LH: loop header
LB: loop body
LE: loop exit
PB: predicated region body
PF: predicated region fallthrough
CT: control target
= control target key end

     0   :  { %s400_s0 = inlined_call_operand.vmem [shape: f32[16,128], index: 0, kind: input, shape index: {}]   ;;  %s401_s1 = inlined_call_operand.vmem [shape: f32[1,128], index: 1, kind: input, shape index: {}]   ;;  %s402_s2 = inlined_call_operand.vmem [shape: f32[1,128], index: 2, kind: input, shape index: {}]   ;;  %s403_s3 = inlined_call_operand.vmem [shape: bf16[128,128], index: 3, kind: input, shape index: {}]   ;;  %s404_s4 = inlined_call_operand.vmem [shape: f32[1,128], index: 4, kind: input, shape index: {}]   ;;  %s405_s5 = inlined_call_operand.hbm [shape: f32[16,128], index: 5, kind: output, shape index: {}]  }
   0x1   :  { %v341_v0 = vld [vmem:[%s400_s0] sm:$0xff] }
   0x2   :  { %23 = vadd.xlane.f32.xlu0 %v341_v0 }
   0x3   :  { %10 = vsyncpa [#allocation3], 0  ;;  %v347_v1 = vld [vmem:[%s400_s0 + $0x8] sm:$0xff]  ;;  %v304_v2 = vmov 128.0   ;;  %v260_v17 = vld [vmem:[%s403_s3 + $0x38] sm:$0xff]  ;;  %s306_s20 = smov 128  }
   0x4   :  { %268 = vrcp.f32 %v304_v2  ;;  %185 = vmatpush.bf16.msra.mxu0 %v260_v17  ;;  %v259_v18 = vld [vmem:[%s403_s3 + $0x30] sm:$0xff]  ;;  %v258_v20 = vld [vmem:[%s403_s3 + $0x28] sm:$0xff]  ;;  %v257_v22 = vld [vmem:[%s403_s3 + $0x20] sm:$0xff] }
   0x5   :  { %v256_v24 = vld [vmem:[%s403_s3 + $0x18] sm:$0xff]  ;;  %v255_v29 = vld [vmem:[%s403_s3 + $0x10] sm:$0xff]  ;;  %v254_v32 = vld [vmem:[%s403_s3 + $0x8] sm:$0xff] }
   0x6   :  { %v253_v38 = vld [vmem:[%s403_s3] sm:$0xff] }
   0x8   :  { %186 = vmatpush.bf16.msra.mxu0 %v259_v18 }
   0xa   :  { %25 = vadd.xlane.f32.xlu0 %v347_v1  ;;  %v269_v3 = vpop.eup %268 }
   0xb   :  { %v28_v4 = vmul.f32 128.0, %v269_v3  ;;  %vm32_vm0 = vweird.f32 %v269_v3 }
   0xc   :  { %187 = vmatpush.bf16.msra.mxu0 %v258_v20 }
   0xd   :  { %v29_v5 = vsub.f32 1.0, %v28_v4 }
   0xf   :  { %v30_v6 = vmul.f32 %v269_v3, %v29_v5 }
  0x10   :  { %188 = vmatpush.bf16.msra.mxu0 %v257_v22 }
  0x11   :  { %v31_v7 = vadd.f32 %v269_v3, %v30_v6 }
  0x13   :  { %v33_v8 = vsel %vm32_vm0, %v269_v3, %v31_v7  ;;  %v265_v7 = vld [vmem:[%s401_s1] ss:$0 sm:$0xff]  ;;  %s305_s1 = smov [#allocation2]  }
  0x14   :  { %189 = vmatpush.bf16.msra.mxu0 %v256_v24  ;;  %s207_s17 = sshll.u32 %s305_s1, 4  ;;  %s208_s17 = int_to_ptr.vmem [resolvable:$true] %s207_s17 }
  0x18   :  { %190 = vmatpush.bf16.msra.mxu0 %v255_v29 }
  0x1c   :  { %191 = vmatpush.bf16.msra.mxu0 %v254_v32 }
  0x20   :  { %192 = vmatpush.bf16.msra.mxu0 %v253_v38 }
  0x75   :  { %v24_v9 = vpop.xlane.xlu0 %23 }
  0x76   :  { %v34_v10 = vmul.f32 %v33_v8, %v24_v9 }
  0x78   :  { %v351_v11 = vsub.f32 %v341_v0, %v34_v10 }
  0x7a   :  { %v38_v12 = vmul.f32 %v351_v11, %v351_v11 }
  0x7c   :  { %40 = vadd.xlane.f32.xlu1 %v38_v12 }
  0x7d   :  { %v26_v13 = vpop.xlane.xlu0 %25 }
  0x7e   :  { %v35_v14 = vmul.f32 %v33_v8, %v26_v13 }
  0x80   :  { %v356_v15 = vsub.f32 %v347_v1, %v35_v14  ;;  %v266_v14 = vld [vmem:[%s402_s2] ss:$0 sm:$0xff]  ;;  %s209_s2 = sshll.u32 %s405_s5, 4  ;;  %s210_s2 = int_to_ptr.hbm [resolvable:$true] %s209_s2 }
  0x82   :  { %v39_v16 = vmul.f32 %v356_v15, %v356_v15 }
  0x84   :  { %42 = vadd.xlane.f32.xlu1 %v39_v16 }
  0xef   :  { %v41_v19 = vpop.xlane.xlu1 %40 }
  0xf0   :  { %v44_v21 = vmul.f32 0.007874016, %v41_v19  ;;  %v267_v19 = vld [vmem:[%s404_s4] ss:$0 sm:$0xff]  ;;  %s307_s4 = smov 8  }
  0xf2   :  { %270 = vrsqrt.f32 %v44_v21  ;;  %vm53_vm1 = vcmp.eq.f32.partialorder %v44_v21, inf  ;;  %v56_v39 = vand.u32 2147483648, %v44_v21  ;;  %vm55_vm2 = vcmp.eq.f32.partialorder %v44_v21, 0.0 }
  0xf7   :  { %v43_v23 = vpop.xlane.xlu1 %42 }
  0xf8   :  { %v271_v25 = vpop.eup %270  ;;  %v45_v26 = vmul.f32 0.007874016, %v43_v23 }
  0xf9   :  { %v47_v27 = vmul.f32 %v271_v25, %v44_v21 }
  0xfa   :  { %272 = vrsqrt.f32 %v45_v26  ;;  %vm65_vm3 = vcmp.eq.f32.partialorder %v45_v26, inf  ;;  %v68_v47 = vand.u32 2147483648, %v45_v26  ;;  %vm67_vm4 = vcmp.eq.f32.partialorder %v45_v26, 0.0 }
  0xfb   :  { %v48_v28 = vmul.f32 %v271_v25, %v47_v27 }
  0xfd   :  { %v49_v30 = vmul.f32 0.5, %v48_v28 }
  0xff   :  { %v50_v31 = vsub.f32 1.5, %v49_v30 }
 0x100   :  { %v273_v33 = vpop.eup %272 }
 0x101   :  { %v51_v34 = vmul.f32 %v271_v25, %v50_v31  ;;  %v59_v35 = vmul.f32 %v273_v33, %v45_v26 }
 0x103   :  { %v52_v36 = vmul.f32 %v51_v34, %v44_v21  ;;  %v60_v37 = vmul.f32 %v273_v33, %v59_v35 }
 0x105   :  { %v54_v40 = vsel %vm53_vm1, %v44_v21, %v52_v36  ;;  %v61_v41 = vmul.f32 0.5, %v60_v37 }
 0x106   :  { %v57_v42 = vsel %vm55_vm2, %v56_v39, %v54_v40 }
 0x107   :  { %v62_v43 = vsub.f32 1.5, %v61_v41  ;;  %v70_v44 = vadd.f32 1e-06, %v57_v42 }
 0x109   :  { %v63_v45 = vmul.f32 %v273_v33, %v62_v43  ;;  %274 = vrcp.f32 %v70_v44  ;;  %v83_v55 = vand.u32 2147483648, %v70_v44  ;;  %vm77_vm6 = vweird.f32 %v70_v44 }
 0x10a   :  { %v81_v57 = vand.u32 2147483647, %v70_v44 }
 0x10b   :  { %v64_v46 = vmul.f32 %v63_v45, %v45_v26  ;;  %v84_v61 = vor.u32 1.1754944e-38, %v83_v55 }
 0x10c   :  { %vm82_vm8 = vcmp.eq.f32.partialorder %v81_v57, 8.507059e+37 }
 0x10d   :  { %v66_v48 = vsel %vm65_vm3, %v45_v26, %v64_v46 }
 0x10e   :  { %v69_v49 = vsel %vm67_vm4, %v68_v47, %v66_v48 }
 0x10f   :  { %v275_v50 = vpop.eup %274  ;;  %v71_v51 = vadd.f32 1e-06, %v69_v49 }
 0x110   :  { %v73_v52 = vmul.f32 %v275_v50, %v70_v44  ;;  %vm78_vm5 = vweird.f32 %v275_v50 }
 0x111   :  { %276 = vrcp.f32 %v71_v51  ;;  %vm79_vm7 = vmor %vm77_vm6, %vm78_vm5  ;;  %v98_v2 = vand.u32 2147483648, %v71_v51  ;;  %v96_v4 = vand.u32 2147483647, %v71_v51  ;;  %vm92_vm10 = vweird.f32 %v71_v51 }
 0x112   :  { %v74_v53 = vsub.f32 1.0, %v73_v52 }
 0x113   :  { %v99_v8 = vor.u32 1.1754944e-38, %v98_v2  ;;  %vm97_vm12 = vcmp.eq.f32.partialorder %v96_v4, 8.507059e+37 }
 0x114   :  { %v75_v54 = vmul.f32 %v275_v50, %v74_v53 }
 0x116   :  { %v76_v56 = vadd.f32 %v275_v50, %v75_v54 }
 0x117   :  { %v277_v58 = vpop.eup %276 }
 0x118   :  { %v80_v59 = vsel %vm79_vm7, %v275_v50, %v76_v56  ;;  %v88_v60 = vmul.f32 %v277_v58, %v71_v51  ;;  %vm93_vm9 = vweird.f32 %v277_v58 }
 0x119   :  { %v85_v63 = vsel %vm82_vm8, %v84_v61, %v80_v59  ;;  %vm94_vm11 = vmor %vm92_vm10, %vm93_vm9 }
 0x11a   :  { %v89_v62 = vsub.f32 1.0, %v88_v60  ;;  %v103_v6 = vmul.f32 %v85_v63, %v351_v11 }
 0x11c   :  { %v90_v3 = vmul.f32 %v277_v58, %v89_v62  ;;  %v108_v13 = vmul.f32 %v265_v7, %v103_v6 }
 0x11e   :  { %v91_v5 = vadd.f32 %v277_v58, %v90_v3  ;;  %v114_v17 = vadd.f32 %v266_v14, %v108_v13 }
 0x120   :  { %v95_v9 = vsel %vm94_vm11, %v277_v58, %v91_v5 }
 0x121   :  { %v100_v10 = vsel %vm97_vm12, %v99_v8, %v95_v9 }
 0x122   :  { %v104_v12 = vmul.f32 %v100_v10, %v356_v15 }
 0x124   :  { %v109_v16 = vmul.f32 %v265_v7, %v104_v12 }
 0x126   :  { %v115_v18 = vadd.f32 %v266_v14, %v109_v16 }
 0x128   :  { %v116_v11 = vpack.c.bf16 %v115_v18, %v114_v17 }
 0x12a   :  { %193 = vmatmul.bf16.vlgmr.msra.gmra.mxu0 %v116_v11 }
 0x1a7   :  { %v194_v20 = vpop.f32.mrf.mxu0 }
 0x1a8   :  { %v195_v21 = vadd.f32 %v267_v19, %v194_v20 }
 0x1aa   :  { %v199_v22 = vadd.f32 %v195_v21, %v341_v0 }
 0x1ac   :  { %201 = vst [vmem:[#allocation2] sm:$0xff] %v199_v22 }
 0x1af   :  { %v196_v15 = vpop.f32.mrf.mxu0 }
 0x1b0   :  { %v197_v23 = vadd.f32 %v267_v19, %v196_v15 }
 0x1b2   :  { %v200_v24 = vadd.f32 %v197_v23, %v347_v1 }
 0x1b4   :  { %202 = vst [vmem:[#allocation2 + $0x8] sm:$0xff] %v200_v24 }
 0x1b5   :  { %215 = dma.vmem_to_hbm [thread:$0]  %s208_s17, 256, %s210_s2, [#allocation3], %s306_s20, %s306_s20, %s307_s4  }
 0x1b6   :  { %302 = dma.done.wait [#allocation3], 256  }
 0x1b7   :  { %303 = vsyncadd [#allocation3], 4294967040 }
 0x1b8   :  { %220 = vsyncpa [#allocation3], 1 }

</bundles_post_ra>
